<compile_context>
chip_gen: v7x
topology: tpu7x:2x2x1
jax: 0.10.0
libtpu: 0.0.40
codegen_flags: <defaults>
</compile_context>

<pallas_src>
import jax
import jax.numpy as jnp
from jax import lax
from jax.experimental import pallas as pl
from jax.experimental.pallas import tpu as pltpu

ROW_TILE = 512  # sweep 512-1024; VMEM use is budgeted explicitly per call below


def _round_up(x, m):
    return ((x + m - 1) // m) * m


def _choose_row_tiling(half, n_batch, tmax=ROW_TILE, min_steps=4):
    """Rows per (batch, time-half) block -> (padded rows, tile, tiles-per-block).

    Guarantees >= min_steps grid steps over the fast matmul (n_batch * nt) so
    v7x's two TensorCores each get >= 2 pipelined steps, while keeping the tile
    as large as possible (<= tmax) to amortise per-step overhead.
    NOTE: padded rows are zero-filled patches; because the convs carry no bias
    (zero-init in torch, cancelled by training-mode BN) they contribute exactly
    zero to the in-kernel BN sums, keeping the batch statistics unbiased.
    """
    nt = max(1, -(-half // tmax), -(-min_steps // max(1, n_batch)))
    tm = max(8, _round_up(-(-half // nt), 8))
    return nt * tm, tm, nt


# ----------------------------- Pallas kernels -----------------------------

def _conv_stats_kernel(a_ref, w_ref, y_ref, sum_ref, sq_ref):
    """bf16 conv-as-matmul + f32 per-tile channel sum / sum-of-squares.

    The accumulator is f32 (preferred_element_type); BN statistics are taken
    from it before the bf16 store, and the two column halves of the acc are
    written to the two leading slices of the (2, tm, Coutp) output block.
    """
    acc = jnp.dot(a_ref[...], w_ref[...], preferred_element_type=jnp.float32)
    cp = y_ref.shape[-1]
    y_ref[0] = acc[:, :cp].astype(y_ref.dtype)   # lane-aligned static split
    y_ref[1] = acc[:, cp:].astype(y_ref.dtype)
    cs = jnp.sum(acc, axis=0, keepdims=True)          # (1, 2*Coutp)
    cq = jnp.sum(acc * acc, axis=0, keepdims=True)
    # Broadcast into all 8 sublanes of the stats tile; host sums every row /8,
    # so the reduction does not depend on which row carries the value.
    sum_ref[...] = jnp.broadcast_to(cs, sum_ref.shape)
    sq_ref[...] = jnp.broadcast_to(cq, sq_ref.shape)


def pallas_conv_stats(a, w, coutp, tm, m_true):
    """(rows, K)bf16 @ (K, 2*Coutp)bf16 -> (2, rows, Coutp)bf16 + BN batch stats.

    mean/var are biased batch statistics over the m_true real rows (padded rows
    are zero because there is no conv bias).
    """
    rows, k = a.shape
    w_width = w.shape[1]                     # 2 * Coutp, multiple of 128
    assert rows % tm == 0
    ng = rows // tm

    # Explicit VMEM budget (double-buffered in/out + f32 acc), with headroom.
    est = 2 * (tm * k * 2 + k * w_width * 2 + 2 * tm * coutp * 2
               + 2 * 8 * w_width * 4) + tm * w_width * 4
    vmem_limit = int(min(64 * 1024 * 1024, max(32 * 1024 * 1024, 2 * est)))

    y, s, ss = pl.pallas_call(
        _conv_stats_kernel,
        out_shape=(jax.ShapeDtypeStruct((2, rows, coutp), jnp.bfloat16),
                   jax.ShapeDtypeStruct((ng * 8, w_width), jnp.float32),
                   jax.ShapeDtypeStruct((ng * 8, w_width), jnp.float32)),
        grid_spec=pltpu.PrefetchScalarGridSpec(
            num_scalar_prefetch=0,
            grid=(ng,),
            in_specs=[
                pl.BlockSpec((tm, k), lambda i: (i, 0)),
                # Constant across the grid.  pipeline_mode=pl.Buffered(1) would
                # single-buffer it (v7x VMEM saving); omitted for compat safety.
                pl.BlockSpec((k, w_width), lambda i: (0, 0)),
            ],
            out_specs=[
                pl.BlockSpec((2, tm, coutp), lambda i: (0, i, 0)),
                pl.BlockSpec((8, w_width), lambda i: (i, 0)),
                pl.BlockSpec((8, w_width), lambda i: (i, 0)),
            ]),
        compiler_params=pltpu.CompilerParams(
            dimension_semantics=("parallel",),
            vmem_limit_bytes=vmem_limit),
    )(a, w)

    col_sum = s.sum(axis=0) / 8.0
    col_sq = ss.sum(axis=0) / 8.0
    mean = col_sum / m_true
    # NOTE: E[x^2]-E[x]^2 in f32; fine here because the bias-free convs have
    # near-zero means.  Consider a Welford tile-reduction at production scale.
    var = jnp.maximum(col_sq / m_true - mean * mean, 0.0)
    return y, mean, var


def _epilogue_kernel(comb_ref, fast_ref, par_ref, o_ref):
    """Fused BN affine (fast/slow/res) + interleave/concat + residual add.

    comb_ref : (2, TM, Coutp) bf16   [0] residual part, [1] slow part (already
                                     positioned at output cols [C2:Cout))
    fast_ref : (TM, Coutp)   bf16    parity-h fast part (positioned at [0:C2))
    par_ref  : (8, Coutp)    f32     rows: fast_scale, res_scale, slow_scale,
                                     total_bias (rest zero)
    """
    res = comb_ref[0].astype(jnp.float32)
    slow = comb_ref[1].astype(jnp.float32)
    fast = fast_ref[...].astype(jnp.float32)
    fast_s = par_ref[0:1, :]
    res_s = par_ref[1:2, :]
    slow_s = par_ref[2:3, :]
    bias = par_ref[3:4, :]
    o_ref[...] = fast * fast_s + res * res_s + slow * slow_s + bias


def pallas_fused_epilogue(comb_y, fast_y, params, n_batch, nt, tm, coutp):
    m1p = comb_y.shape[1]                     # n_batch * 2 * halfp

    est = 2 * (2 * tm * coutp * 2 + tm * coutp * 2 + 8 * coutp * 4
               + tm * coutp * 4)
    vmem_limit = int(min(64 * 1024 * 1024, max(32 * 1024 * 1024, 2 * est)))

    return pl.pallas_call(
        _epilogue_kernel,
        out_shape=jax.ShapeDtypeStruct((m1p, coutp), jnp.float32),
        grid_spec=pltpu.PrefetchScalarGridSpec(
            num_scalar_prefetch=0,
            grid=(n_batch, 2, nt),            # (batch, time-half, row tile)
            in_specs=[
                # residual + slow parts: rows of this (batch, half, tile)
                pl.BlockSpec((2, tm, coutp),
                             lambda b, h, j: (0, (b * 2 + h) * nt + j, 0)),
                # fast parity block h, same rows for both time halves
                pl.BlockSpec((None, tm, coutp),
                             lambda b, h, j: (h, b * nt + j, 0)),
                # per-parity BN affine params
                pl.BlockSpec((None, 8, coutp), lambda b, h, j: (h, 0, 0)),
            ],
            out_specs=pl.BlockSpec((tm, coutp),
                                   lambda b, h, j: ((b * 2 + h) * nt + j, 0))),
        compiler_params=pltpu.CompilerParams(
            dimension_semantics=("parallel", "parallel", "parallel"),
            vmem_limit_bytes=vmem_limit),
    )(comb_y, fast_y, params)


# -------------------------------- JAX glue --------------------------------

def im2col(x, kh, kw, stride, pad):
    """x: (N, C, H, W) -> patches (N*Ho*Wo, C*kh*kw), K order = c*kh*kw + i*kw + j."""
    n, c, h, w = x.shape
    sh, sw = stride
    xp = jnp.pad(x, ((0, 0), (0, 0), (pad, pad), (pad, pad)))
    ho = (h + 2 * pad - kh) // sh + 1
    wo = (w + 2 * pad - kw) // sw + 1
    cols = []
    for i in range(kh):
        for j in range(kw):
            cols.append(xp[:, :, i:i + sh * ho:sh, j:j + sw * wo:sw])
    stacked = jnp.stack(cols, axis=2)                     # (N, C, kh*kw, Ho, Wo)
    patches = stacked.reshape(n, c * kh * kw, ho, wo)
    patches = patches.transpose(0, 2, 3, 1).reshape(n * ho * wo, c * kh * kw)
    return patches, ho, wo


def st_feature_extraction_forward(x, p, eps=1e-5, row_tile=ROW_TILE):
    n, cin, t, v = x.shape
    cout = p['res_w'].shape[0]
    assert cout % 2 == 0 and t % 2 == 0
    c2 = cout // 2
    th = t // 2
    k = cin * 9
    half = th * v                               # rows per (batch, time-half)
    coutp = _round_up(cout, 128)                # lane-dense channel padding
    w_width = 2 * coutp

    halfp, tm, nt = _choose_row_tiling(half, n, row_tile)

    # ---- patch extraction (layout glue) ----
    # TODO(synk): at production T*V replace im2col with in-kernel kh*kw halo
    # accumulation (and fold the fast conv into the comb matmul) to cut the
    # 9x patch-matrix HBM traffic.
    p1, _, _ = im2col(x, 3, 3, (1, 1), 1)       # stride-1 grid (residual + slow)
    p2, _, _ = im2col(x, 3, 3, (2, 1), 1)       # stride-(2,1) grid (fast)

    def pad_rows(pm, blocks):
        pm = pm.reshape(n, blocks, half, k)
        if halfp != half:
            pm = jnp.pad(pm, ((0, 0), (0, 0), (0, halfp - half), (0, 0)))
        return pm.reshape(n * blocks * halfp, k).astype(jnp.bfloat16)

    p1 = pad_rows(p1, 2)                        # (N*2*halfp, K) bf16
    p2 = pad_rows(p2, 1)                        # (N*halfp,   K) bf16

    # ---- weights: every column already sits at its final output column ----
    w_res = p['res_w'].reshape(cout, cin)
    w_slow = p['slow_w'].reshape(c2, k)
    w_fast = p['fast_w'].reshape(cout, k)

    # comb columns: [0:Coutp) residual (1x1 conv = centre tap of the 3x3 patch),
    #               [Coutp:2Coutp) slow, shifted to output cols [C2:Cout).
    w_comb = jnp.zeros((k, w_width), jnp.float32)
    w_comb = w_comb.at[4::9, :cout].set(w_res.T)
    w_comb = w_comb.at[:, coutp + c2:coutp + cout].set(w_slow.T)
    w_comb = w_comb.astype(jnp.bfloat16)

    # fast columns: [0:Coutp) even-parity channels at cols [0:C2),
    #               [Coutp:2Coutp) odd-parity channels at cols [0:C2).
    w_fast2 = jnp.zeros((k, w_width), jnp.float32)
    w_fast2 = w_fast2.at[:, :c2].set(w_fast[0::2].T)
    w_fast2 = w_fast2.at[:, coutp:coutp + c2].set(w_fast[1::2].T)
    w_fast2 = w_fast2.astype(jnp.bfloat16)

    # ---- fused conv matmuls + in-kernel BN batch statistics ----
    comb_y, comb_mean, comb_var = pallas_conv_stats(p1, w_comb, coutp, tm,
                                                    m_true=n * 2 * half)
    fast_y, fast_mean, fast_var = pallas_conv_stats(p2, w_fast2, coutp, tm,
                                                    m_true=n * half)

    # ---- BN affine coefficients (tiny, host-side JAX work) ----
    def affine(gamma, beta, mean, var):
        s = gamma / jnp.sqrt(var + eps)
        return s, beta - mean * s

    res_s, res_b = affine(p['res_gamma'], p['res_beta'],
                          comb_mean[:cout], comb_var[:cout])
    slow_s, slow_b = affine(p['slow_gamma'], p['slow_beta'],
                            comb_mean[coutp + c2:coutp + cout],
                            comb_var[coutp + c2:coutp + cout])
    f_even_s, f_even_b = affine(p['fast_gamma'][0::2], p['fast_beta'][0::2],
                                fast_mean[:c2], fast_var[:c2])
    f_odd_s, f_odd_b = affine(p['fast_gamma'][1::2], p['fast_beta'][1::2],
                              fast_mean[coutp:coutp + c2],
                              fast_var[coutp:coutp + c2])

    def place(vec, start):
        out = jnp.zeros((coutp,), jnp.float32)
        return out.at[start:start + vec.shape[0]].set(vec)

    res_s_p, res_b_p = place(res_s, 0), place(res_b, 0)
    slow_s_p, slow_b_p = place(slow_s, c2), place(slow_b, c2)

    def param_block(fast_scale_p, fast_bias_p):
        blk = jnp.zeros((8, coutp), jnp.float32)
        blk = blk.at[0].set(fast_scale_p)
        blk = blk.at[1].set(res_s_p)
        blk = blk.at[2].set(slow_s_p)
        blk = blk.at[3].set(fast_bias_p + res_b_p + slow_b_p)
        return blk

    params = jnp.stack([param_block(place(f_even_s, 0), place(f_even_b, 0)),
                        param_block(place(f_odd_s, 0), place(f_odd_b, 0))])

    # ---- fused epilogue: interleave + concat + residual + BN affine ----
    out_flat = pallas_fused_epilogue(comb_y, fast_y, params, n, nt, tm, coutp)

    # de-pad once + final NCHW transpose (layout glue)
    out = out_flat.reshape(n, 2, halfp, coutp)[:, :, :half, :cout]
    out = out.reshape(n, t, v, cout).transpose(0, 3, 1, 2)
    return out


# ------------------------ deterministic param init ------------------------

def init_params(key, cin, cout):
    # Conv biases are zero-initialised in the torch module and cancelled by
    # training-mode BatchNorm, so they are omitted entirely.
    ks = jax.random.split(key, 6)

    def kaiming_fan_out(k, shape):
        fan_out = shape[0] * shape[2] * shape[3]
        return jax.random.normal(k, shape, jnp.float32) * jnp.sqrt(2.0 / fan_out)

    return dict(
        res_w=kaiming_fan_out(ks[0], (cout, cin, 1, 1)),
        res_gamma=1.0 + 0.02 * jax.random.normal(ks[1], (cout,), jnp.float32),
        res_beta=jnp.zeros((cout,), jnp.float32),
        fast_w=kaiming_fan_out(ks[2], (cout, cin, 3, 3)),
        fast_gamma=1.0 + 0.02 * jax.random.normal(ks[3], (cout,), jnp.float32),
        fast_beta=jnp.zeros((cout,), jnp.float32),
        # TODO(synk): `slow_path` is not defined in the provided source; assumed
        # Conv2d(in, out//2, 3, stride=1, padding=1) + BatchNorm2d (the only
        # shape consistent with the forward's concat/add algebra).
        slow_w=kaiming_fan_out(ks[4], (cout // 2, cin, 3, 3)),
        slow_gamma=1.0 + 0.02 * jax.random.normal(ks[5], (cout // 2,), jnp.float32),
        slow_beta=jnp.zeros((cout // 2,), jnp.float32),
    )


# --------------------------- pure-JAX reference ---------------------------

def ref_forward(x, p):
    def conv(xx, w, stride, pad):
        return lax.conv_general_dilated(
            xx, w, window_strides=stride, padding=[(pad, pad), (pad, pad)],
            dimension_numbers=('NCHW', 'OIHW', 'NCHW'),
            precision=lax.Precision.HIGHEST)

    def bn(y, g, b, eps=1e-5):
        mean = y.mean(axis=(0, 2, 3), keepdims=True)
        var = y.var(axis=(0, 2, 3), keepdims=True)
        return (y - mean) / jnp.sqrt(var + eps) * g.reshape(1, -1, 1, 1) \
            + b.reshape(1, -1, 1, 1)

    n, cin, t, v = x.shape
    res = bn(conv(x, p['res_w'], (1, 1), 0), p['res_gamma'], p['res_beta'])
    out1 = bn(conv(x, p['fast_w'], (2, 1), 1), p['fast_gamma'], p['fast_beta'])
    out2 = bn(conv(x, p['slow_w'], (1, 1), 1), p['slow_gamma'], p['slow_beta'])
    out1 = out1.reshape(n, -1, out1.shape[3]).reshape(n, -1, t, v)
    return jnp.concatenate([out1, out2], axis=1) + res


if __name__ == "__main__":
    key = jax.random.PRNGKey(0)
    kx, kp = jax.random.split(key)

    N, Cin, T, V = 2, 4, 16, 16   # x: (batch, in_channels, time, joints), NCHW
    Cout = 8                      # out_channels (must be even)

    x = jax.random.normal(kx, (N, Cin, T, V), jnp.float32)
    params = init_params(kp, Cin, Cout)

    fwd = jax.jit(st_feature_extraction_forward)
    out = jax.block_until_ready(fwd(x, params))

    assert out.shape == (N, Cout, T, V), out.shape
    ref = ref_forward(x, params)
    max_err = float(jnp.max(jnp.abs(out - ref)))
    # bf16 patches/weights/intermediates => ~1e-2-scale rounding; stats are f32.
    if not jnp.allclose(out, ref, atol=3e-2, rtol=3e-2):
        raise AssertionError(f"mismatch vs reference, max abs err = {max_err}")

    print("KERNEL_OK")
</pallas_src>

<mosaic_0001>
module attributes {stable_mosaic.version = 11 : i64} {
  func.func @_conv_stats_kernel(%arg0: i32, %arg1: memref<64x36xbf16, #tpu.memory_space<vmem>>, %arg2: memref<36x256xbf16, #tpu.memory_space<vmem>>, %arg3: memref<2x64x128xbf16, #tpu.memory_space<vmem>>, %arg4: memref<8x256xf32, #tpu.memory_space<vmem>>, %arg5: memref<8x256xf32, #tpu.memory_space<vmem>>) attributes {dimension_semantics = [#tpu.dimension_semantics<parallel>], iteration_bounds = array<i64: 8>, scalar_prefetch = 0 : i64, scratch_operands = 0 : i64, tpu.core_type = #tpu.core_type<tc>, window_params = [{transform_indices = @transform_0, window_bounds = array<i64: 64, 36>}, {pipeline_mode = #tpu.pipeline_mode<synchronous>, transform_indices = @transform_1, window_bounds = array<i64: 36, 256>}, {transform_indices = @transform_2, window_bounds = array<i64: 2, 64, 128>}, {transform_indices = @transform_3, window_bounds = array<i64: 8, 256>}, {transform_indices = @transform_4, window_bounds = array<i64: 8, 256>}]} {
    %c0 = arith.constant 0 : index
    %c0_0 = arith.constant 0 : index
    %0 = vector.load %arg1[%c0, %c0_0] : memref<64x36xbf16, #tpu.memory_space<vmem>>, vector<64x36xbf16>
    %c0_1 = arith.constant 0 : index
    %c0_2 = arith.constant 0 : index
    %1 = vector.load %arg2[%c0_1, %c0_2] : memref<36x256xbf16, #tpu.memory_space<vmem>>, vector<36x256xbf16>
    %cst = arith.constant dense<0.000000e+00> : vector<64x256xf32>
    %2 = tpu.matmul %0, %1, %cst {dimension_numbers = #tpu.dot_dimension_numbers<[1], [0], [0], [1], [0, 0, 1, 1], [], []>} : vector<64x36xbf16>, vector<36x256xbf16>, vector<64x256xf32> -> vector<64x256xf32>
    %3 = vector.extract_strided_slice %2 {offsets = [0, 0], sizes = [64, 128], strides = [1, 1]} : vector<64x256xf32> to vector<64x128xf32>
    %4 = arith.truncf %3 : vector<64x128xf32> to vector<64x128xbf16>
    %c0_3 = arith.constant 0 : index
    %c0_4 = arith.constant 0 : index
    %c0_5 = arith.constant 0 : index
    %5 = vector.load %arg3[%c0_3, %c0_4, %c0_5] : memref<2x64x128xbf16, #tpu.memory_space<vmem>>, vector<1x64x128xbf16>
    %6 = vector.shape_cast %5 : vector<1x64x128xbf16> to vector<64x128xbf16>
    %7 = vector.shape_cast %4 : vector<64x128xbf16> to vector<1x64x128xbf16>
    tpu.vector_store %arg3[%c0_3, %c0_4, %c0_5], %7 {strides = array<i32>} : memref<2x64x128xbf16, #tpu.memory_space<vmem>>, vector<1x64x128xbf16>,
    %8 = vector.extract_strided_slice %2 {offsets = [0, 128], sizes = [64, 128], strides = [1, 1]} : vector<64x256xf32> to vector<64x128xf32>
    %9 = arith.truncf %8 : vector<64x128xf32> to vector<64x128xbf16>
    %c1 = arith.constant 1 : index
    %c0_6 = arith.constant 0 : index
    %c0_7 = arith.constant 0 : index
    %10 = vector.load %arg3[%c1, %c0_6, %c0_7] : memref<2x64x128xbf16, #tpu.memory_space<vmem>>, vector<1x64x128xbf16>
    %11 = vector.shape_cast %10 : vector<1x64x128xbf16> to vector<64x128xbf16>
    %12 = vector.shape_cast %9 : vector<64x128xbf16> to vector<1x64x128xbf16>
    tpu.vector_store %arg3[%c1, %c0_6, %c0_7], %12 {strides = array<i32>} : memref<2x64x128xbf16, #tpu.memory_space<vmem>>, vector<1x64x128xbf16>,
    %cst_8 = arith.constant dense<0.000000e+00> : vector<256xf32>
    %13 = vector.multi_reduction <add>, %2, %cst_8 [0] : vector<64x256xf32> to vector<256xf32>
    %14 = vector.shape_cast %13 : vector<256xf32> to vector<1x256xf32>
    %15 = arith.mulf %2, %2 : vector<64x256xf32>
    %cst_9 = arith.constant dense<0.000000e+00> : vector<256xf32>
    %16 = vector.multi_reduction <add>, %15, %cst_9 [0] : vector<64x256xf32> to vector<256xf32>
    %17 = vector.shape_cast %16 : vector<256xf32> to vector<1x256xf32>
    %18 = vector.shape_cast %14 : vector<1x256xf32> to vector<1x256xf32>
    %19 = vector.broadcast %18 : vector<1x256xf32> to vector<8x256xf32>
    %c0_10 = arith.constant 0 : index
    %c0_11 = arith.constant 0 : index
    %20 = vector.load %arg4[%c0_10, %c0_11] : memref<8x256xf32, #tpu.memory_space<vmem>>, vector<8x256xf32>
    tpu.vector_store %arg4[%c0_10, %c0_11], %19 {strides = array<i32>} : memref<8x256xf32, #tpu.memory_space<vmem>>, vector<8x256xf32>,
    %21 = vector.shape_cast %17 : vector<1x256xf32> to vector<1x256xf32>
    %22 = vector.broadcast %21 : vector<1x256xf32> to vector<8x256xf32>
    %c0_12 = arith.constant 0 : index
    %c0_13 = arith.constant 0 : index
    %23 = vector.load %arg5[%c0_12, %c0_13] : memref<8x256xf32, #tpu.memory_space<vmem>>, vector<8x256xf32>
    tpu.vector_store %arg5[%c0_12, %c0_13], %22 {strides = array<i32>} : memref<8x256xf32, #tpu.memory_space<vmem>>, vector<8x256xf32>,
    return
  }
  func.func @transform_0(%arg0: i32) -> (i32, i32) {
    %c0_i32 = arith.constant 0 : i32
    %c0_i32_0 = arith.constant 0 : i32
    return %arg0, %c0_i32 : i32, i32
  }
  func.func @transform_1(%arg0: i32) -> (i32, i32) {
    %c0_i32 = arith.constant 0 : i32
    %c0_i32_0 = arith.constant 0 : i32
    %c0_i32_1 = arith.constant 0 : i32
    return %c0_i32, %c0_i32_0 : i32, i32
  }
  func.func @transform_2(%arg0: i32) -> (i32, i32, i32) {
    %c0_i32 = arith.constant 0 : i32
    %c0_i32_0 = arith.constant 0 : i32
    %c0_i32_1 = arith.constant 0 : i32
    return %c0_i32, %arg0, %c0_i32_0 : i32, i32, i32
  }
  func.func @transform_3(%arg0: i32) -> (i32, i32) {
    %c0_i32 = arith.constant 0 : i32
    %c0_i32_0 = arith.constant 0 : i32
    return %arg0, %c0_i32 : i32, i32
  }
  func.func @transform_4(%arg0: i32) -> (i32, i32) {
    %c0_i32 = arith.constant 0 : i32
    %c0_i32_0 = arith.constant 0 : i32
    return %arg0, %c0_i32 : i32, i32
  }
}

module attributes {stable_mosaic.version = 11 : i64} {
  func.func @_conv_stats_kernel(%arg0: i32, %arg1: memref<64x36xbf16, #tpu.memory_space<vmem>>, %arg2: memref<36x256xbf16, #tpu.memory_space<vmem>>, %arg3: memref<2x64x128xbf16, #tpu.memory_space<vmem>>, %arg4: memref<8x256xf32, #tpu.memory_space<vmem>>, %arg5: memref<8x256xf32, #tpu.memory_space<vmem>>) attributes {dimension_semantics = [#tpu.dimension_semantics<parallel>], iteration_bounds = array<i64: 4>, scalar_prefetch = 0 : i64, scratch_operands = 0 : i64, tpu.core_type = #tpu.core_type<tc>, window_params = [{transform_indices = @transform_0, window_bounds = array<i64: 64, 36>}, {pipeline_mode = #tpu.pipeline_mode<synchronous>, transform_indices = @transform_1, window_bounds = array<i64: 36, 256>}, {transform_indices = @transform_2, window_bounds = array<i64: 2, 64, 128>}, {transform_indices = @transform_3, window_bounds = array<i64: 8, 256>}, {transform_indices = @transform_4, window_bounds = array<i64: 8, 256>}]} {
    %c0 = arith.constant 0 : index
    %c0_0 = arith.constant 0 : index
    %0 = vector.load %arg1[%c0, %c0_0] : memref<64x36xbf16, #tpu.memory_space<vmem>>, vector<64x36xbf16>
    %c0_1 = arith.constant 0 : index
    %c0_2 = arith.constant 0 : index
    %1 = vector.load %arg2[%c0_1, %c0_2] : memref<36x256xbf16, #tpu.memory_space<vmem>>, vector<36x256xbf16>
    %cst = arith.constant dense<0.000000e+00> : vector<64x256xf32>
    %2 = tpu.matmul %0, %1, %cst {dimension_numbers = #tpu.dot_dimension_numbers<[1], [0], [0], [1], [0, 0, 1, 1], [], []>} : vector<64x36xbf16>, vector<36x256xbf16>, vector<64x256xf32> -> vector<64x256xf32>
    %3 = vector.extract_strided_slice %2 {offsets = [0, 0], sizes = [64, 128], strides = [1, 1]} : vector<64x256xf32> to vector<64x128xf32>
    %4 = arith.truncf %3 : vector<64x128xf32> to vector<64x128xbf16>
    %c0_3 = arith.constant 0 : index
    %c0_4 = arith.constant 0 : index
    %c0_5 = arith.constant 0 : index
    %5 = vector.load %arg3[%c0_3, %c0_4, %c0_5] : memref<2x64x128xbf16, #tpu.memory_space<vmem>>, vector<1x64x128xbf16>
    %6 = vector.shape_cast %5 : vector<1x64x128xbf16> to vector<64x128xbf16>
    %7 = vector.shape_cast %4 : vector<64x128xbf16> to vector<1x64x128xbf16>
    tpu.vector_store %arg3[%c0_3, %c0_4, %c0_5], %7 {strides = array<i32>} : memref<2x64x128xbf16, #tpu.memory_space<vmem>>, vector<1x64x128xbf16>,
    %8 = vector.extract_strided_slice %2 {offsets = [0, 128], sizes = [64, 128], strides = [1, 1]} : vector<64x256xf32> to vector<64x128xf32>
    %9 = arith.truncf %8 : vector<64x128xf32> to vector<64x128xbf16>
    %c1 = arith.constant 1 : index
    %c0_6 = arith.constant 0 : index
    %c0_7 = arith.constant 0 : index
    %10 = vector.load %arg3[%c1, %c0_6, %c0_7] : memref<2x64x128xbf16, #tpu.memory_space<vmem>>, vector<1x64x128xbf16>
    %11 = vector.shape_cast %10 : vector<1x64x128xbf16> to vector<64x128xbf16>
    %12 = vector.shape_cast %9 : vector<64x128xbf16> to vector<1x64x128xbf16>
    tpu.vector_store %arg3[%c1, %c0_6, %c0_7], %12 {strides = array<i32>} : memref<2x64x128xbf16, #tpu.memory_space<vmem>>, vector<1x64x128xbf16>,
    %cst_8 = arith.constant dense<0.000000e+00> : vector<256xf32>
    %13 = vector.multi_reduction <add>, %2, %cst_8 [0] : vector<64x256xf32> to vector<256xf32>
    %14 = vector.shape_cast %13 : vector<256xf32> to vector<1x256xf32>
    %15 = arith.mulf %2, %2 : vector<64x256xf32>
    %cst_9 = arith.constant dense<0.000000e+00> : vector<256xf32>
    %16 = vector.multi_reduction <add>, %15, %cst_9 [0] : vector<64x256xf32> to vector<256xf32>
    %17 = vector.shape_cast %16 : vector<256xf32> to vector<1x256xf32>
    %18 = vector.shape_cast %14 : vector<1x256xf32> to vector<1x256xf32>
    %19 = vector.broadcast %18 : vector<1x256xf32> to vector<8x256xf32>
    %c0_10 = arith.constant 0 : index
    %c0_11 = arith.constant 0 : index
    %20 = vector.load %arg4[%c0_10, %c0_11] : memref<8x256xf32, #tpu.memory_space<vmem>>, vector<8x256xf32>
    tpu.vector_store %arg4[%c0_10, %c0_11], %19 {strides = array<i32>} : memref<8x256xf32, #tpu.memory_space<vmem>>, vector<8x256xf32>,
    %21 = vector.shape_cast %17 : vector<1x256xf32> to vector<1x256xf32>
    %22 = vector.broadcast %21 : vector<1x256xf32> to vector<8x256xf32>
    %c0_12 = arith.constant 0 : index
    %c0_13 = arith.constant 0 : index
    %23 = vector.load %arg5[%c0_12, %c0_13] : memref<8x256xf32, #tpu.memory_space<vmem>>, vector<8x256xf32>
    tpu.vector_store %arg5[%c0_12, %c0_13], %22 {strides = array<i32>} : memref<8x256xf32, #tpu.memory_space<vmem>>, vector<8x256xf32>,
    return
  }
  func.func @transform_0(%arg0: i32) -> (i32, i32) {
    %c0_i32 = arith.constant 0 : i32
    %c0_i32_0 = arith.constant 0 : i32
    return %arg0, %c0_i32 : i32, i32
  }
  func.func @transform_1(%arg0: i32) -> (i32, i32) {
    %c0_i32 = arith.constant 0 : i32
    %c0_i32_0 = arith.constant 0 : i32
    %c0_i32_1 = arith.constant 0 : i32
    return %c0_i32, %c0_i32_0 : i32, i32
  }
  func.func @transform_2(%arg0: i32) -> (i32, i32, i32) {
    %c0_i32 = arith.constant 0 : i32
    %c0_i32_0 = arith.constant 0 : i32
    %c0_i32_1 = arith.constant 0 : i32
    return %c0_i32, %arg0, %c0_i32_0 : i32, i32, i32
  }
  func.func @transform_3(%arg0: i32) -> (i32, i32) {
    %c0_i32 = arith.constant 0 : i32
    %c0_i32_0 = arith.constant 0 : i32
    return %arg0, %c0_i32 : i32, i32
  }
  func.func @transform_4(%arg0: i32) -> (i32, i32) {
    %c0_i32 = arith.constant 0 : i32
    %c0_i32_0 = arith.constant 0 : i32
    return %arg0, %c0_i32 : i32, i32
  }
}

module attributes {stable_mosaic.version = 11 : i64} {
  func.func @_epilogue_kernel(%arg0: i32, %arg1: i32, %arg2: i32, %arg3: memref<2x64x128xbf16, #tpu.memory_space<vmem>>, %arg4: memref<1x64x128xbf16, #tpu.memory_space<vmem>>, %arg5: memref<1x8x128xf32, #tpu.memory_space<vmem>>, %arg6: memref<64x128xf32, #tpu.memory_space<vmem>>) attributes {dimension_semantics = [#tpu.dimension_semantics<parallel>, #tpu.dimension_semantics<parallel>, #tpu.dimension_semantics<parallel>], iteration_bounds = array<i64: 2, 2, 2>, scalar_prefetch = 0 : i64, scratch_operands = 0 : i64, tpu.core_type = #tpu.core_type<tc>, window_params = [{transform_indices = @transform_0, window_bounds = array<i64: 2, 64, 128>}, {transform_indices = @transform_1, window_bounds = array<i64: 1, 64, 128>}, {transform_indices = @transform_2, window_bounds = array<i64: 1, 8, 128>}, {transform_indices = @transform_3, window_bounds = array<i64: 64, 128>}]} {
    %c0 = arith.constant 0 : index
    %c0_0 = arith.constant 0 : index
    %c0_1 = arith.constant 0 : index
    %0 = vector.load %arg3[%c0, %c0_0, %c0_1] : memref<2x64x128xbf16, #tpu.memory_space<vmem>>, vector<1x64x128xbf16>
    %1 = vector.shape_cast %0 : vector<1x64x128xbf16> to vector<64x128xbf16>
    %2 = arith.extf %1 : vector<64x128xbf16> to vector<64x128xf32>
    %c1 = arith.constant 1 : index
    %c0_2 = arith.constant 0 : index
    %c0_3 = arith.constant 0 : index
    %3 = vector.load %arg3[%c1, %c0_2, %c0_3] : memref<2x64x128xbf16, #tpu.memory_space<vmem>>, vector<1x64x128xbf16>
    %4 = vector.shape_cast %3 : vector<1x64x128xbf16> to vector<64x128xbf16>
    %5 = arith.extf %4 : vector<64x128xbf16> to vector<64x128xf32>
    %c0_4 = arith.constant 0 : index
    %c0_5 = arith.constant 0 : index
    %c0_6 = arith.constant 0 : index
    %6 = vector.load %arg4[%c0_4, %c0_5, %c0_6] : memref<1x64x128xbf16, #tpu.memory_space<vmem>>, vector<1x64x128xbf16>
    %7 = vector.shape_cast %6 : vector<1x64x128xbf16> to vector<64x128xbf16>
    %8 = arith.extf %7 : vector<64x128xbf16> to vector<64x128xf32>
    %c0_7 = arith.constant 0 : index
    %c0_8 = arith.constant 0 : index
    %c0_9 = arith.constant 0 : index
    %9 = vector.load %arg5[%c0_7, %c0_8, %c0_9] : memref<1x8x128xf32, #tpu.memory_space<vmem>>, vector<1x1x128xf32>
    %10 = vector.shape_cast %9 : vector<1x1x128xf32> to vector<1x128xf32>
    %c0_10 = arith.constant 0 : index
    %c1_11 = arith.constant 1 : index
    %c0_12 = arith.constant 0 : index
    %11 = vector.load %arg5[%c0_10, %c1_11, %c0_12] : memref<1x8x128xf32, #tpu.memory_space<vmem>>, vector<1x1x128xf32>
    %12 = vector.shape_cast %11 : vector<1x1x128xf32> to vector<1x128xf32>
    %c0_13 = arith.constant 0 : index
    %c2 = arith.constant 2 : index
    %c0_14 = arith.constant 0 : index
    %13 = vector.load %arg5[%c0_13, %c2, %c0_14] : memref<1x8x128xf32, #tpu.memory_space<vmem>>, vector<1x1x128xf32>
    %14 = vector.shape_cast %13 : vector<1x1x128xf32> to vector<1x128xf32>
    %c0_15 = arith.constant 0 : index
    %c3 = arith.constant 3 : index
    %c0_16 = arith.constant 0 : index
    %15 = vector.load %arg5[%c0_15, %c3, %c0_16] : memref<1x8x128xf32, #tpu.memory_space<vmem>>, vector<1x1x128xf32>
    %16 = vector.shape_cast %15 : vector<1x1x128xf32> to vector<1x128xf32>
    %17 = vector.broadcast %10 : vector<1x128xf32> to vector<64x128xf32>
    %18 = arith.mulf %8, %17 : vector<64x128xf32>
    %19 = vector.broadcast %12 : vector<1x128xf32> to vector<64x128xf32>
    %20 = arith.mulf %2, %19 : vector<64x128xf32>
    %21 = arith.addf %18, %20 : vector<64x128xf32>
    %22 = vector.broadcast %14 : vector<1x128xf32> to vector<64x128xf32>
    %23 = arith.mulf %5, %22 : vector<64x128xf32>
    %24 = arith.addf %21, %23 : vector<64x128xf32>
    %25 = vector.broadcast %16 : vector<1x128xf32> to vector<64x128xf32>
    %26 = arith.addf %24, %25 : vector<64x128xf32>
    %c0_17 = arith.constant 0 : index
    %c0_18 = arith.constant 0 : index
    %27 = vector.load %arg6[%c0_17, %c0_18] : memref<64x128xf32, #tpu.memory_space<vmem>>, vector<64x128xf32>
    tpu.vector_store %arg6[%c0_17, %c0_18], %26 {strides = array<i32>} : memref<64x128xf32, #tpu.memory_space<vmem>>, vector<64x128xf32>,
    return
  }
  func.func @transform_0(%arg0: i32, %arg1: i32, %arg2: i32) -> (i32, i32, i32) {
    %c2_i32 = arith.constant 2 : i32
    %0 = arith.muli %arg0, %c2_i32 : i32
    %1 = arith.addi %0, %arg1 : i32
    %c2_i32_0 = arith.constant 2 : i32
    %2 = arith.muli %1, %c2_i32_0 : i32
    %3 = arith.addi %2, %arg2 : i32
    %c0_i32 = arith.constant 0 : i32
    %c0_i32_1 = arith.constant 0 : i32
    %c0_i32_2 = arith.constant 0 : i32
    return %c0_i32, %3, %c0_i32_1 : i32, i32, i32
  }
  func.func @transform_1(%arg0: i32, %arg1: i32, %arg2: i32) -> (i32, i32, i32) {
    %c2_i32 = arith.constant 2 : i32
    %0 = arith.muli %arg0, %c2_i32 : i32
    %1 = arith.addi %0, %arg2 : i32
    %c0_i32 = arith.constant 0 : i32
    %c0_i32_0 = arith.constant 0 : i32
    return %arg1, %1, %c0_i32 : i32, i32, i32
  }
  func.func @transform_2(%arg0: i32, %arg1: i32, %arg2: i32) -> (i32, i32, i32) {
    %c0_i32 = arith.constant 0 : i32
    %c0_i32_0 = arith.constant 0 : i32
    %c0_i32_1 = arith.constant 0 : i32
    return %arg1, %c0_i32, %c0_i32_0 : i32, i32, i32
  }
  func.func @transform_3(%arg0: i32, %arg1: i32, %arg2: i32) -> (i32, i32) {
    %c2_i32 = arith.constant 2 : i32
    %0 = arith.muli %arg0, %c2_i32 : i32
    %1 = arith.addi %0, %arg1 : i32
    %c2_i32_0 = arith.constant 2 : i32
    %2 = arith.muli %1, %c2_i32_0 : i32
    %3 = arith.addi %2, %arg2 : i32
    %c0_i32 = arith.constant 0 : i32
    %c0_i32_1 = arith.constant 0 : i32
    return %3, %c0_i32 : i32, i32
  }
}

</mosaic_0001>

<bundles_post_ra>
// kernel: st_feature_extraction_forward.3
= control target key start
LH: loop header
LB: loop body
LE: loop exit
PB: predicated region body
PF: predicated region fallthrough
CT: control target
= control target key end

     0   :  { %s965_s15 = smov 0   ;;  %s967_s16 = smov 0   ;;  %s1056_s0 = inlined_call_operand.vmem [shape: bf16[512,36], index: 0, kind: input, shape index: {}]   ;;  %s1057_s1 = inlined_call_operand.vmem [shape: bf16[36,256], index: 1, kind: input, shape index: {}]   ;;  %s1058_s2 = inlined_call_operand.vmem [shape: bf16[2,512,128], index: 2, kind: output, shape index: {0}]   ;;  %s1059_s3 = inlined_call_operand.vmem [shape: f32[64,256], index: 3, kind: output, shape index: {1}]   ;;  %s1060_s4 = inlined_call_operand.vmem [shape: f32[64,256], index: 4, kind: output, shape index: {2}]  }
   0x1   :  { %s969_s17 = smov 0  }
   0x2 LB: > { %s978_s18 = sadd.s32 4294967295, %s937_s17   ;;  %s980_s19 = sadd.s32 1, %s937_s17   ;;  %s937_s17 = sphi %s969_s17, %s1064_s17   ;;  %s933_s16 = sphi %s967_s16, %s1063_s16   ;;  %s929_s15 = sphi %s965_s15, %s1062_s15  }
   0x3   : > { %s66_s20 = ssub.s32 %s937_s17, %s980_s19  ;;  %s69_s21 = sadd.s32 1, %s933_s16 }
   0x4   : > { %p67_p0 = scmp.eq.s32.totalorder %s66_s20, 0  ;;  %p79_p1 = scmp.ne.s32.totalorder %s933_s16, %s929_s15 }
   0x5   : > { %p80_p2 = scmp.eq.s32.totalorder %s978_s18, 7  ;;  %p754_p3 = scmp.ge.s32.totalorder %s937_s17, 1 }
   0x6   : > { %s988_s22 = scalar_select %p67_p0, %s933_s16, %s69_s21  }
   0x7   : > { %p990_p4 = por %p80_p2, %p79_p1  ;;  %p168_p5 = scmp.lt.s32.totalorder %s937_s17, 9 }
   0x9   : > { %p169_p6 = pnand %p754_p3, %p168_p5 }
   0xa   : > { %v903_v0 = vld [vmem:[%s1057_s1 + $0x4] ss:$8 sps:$4 sm:$0xff] (!%p169_p6)   ;;  %v905_v1 = vld [vmem:[%s1057_s1] ss:$8 sps:$4 sm:$0xff] (!%p169_p6)   ;;  %v939_v2 = vmov (!%p169_p6), 0   ;;  %s756_s28 = sshll.u32 (!%p169_p6), %s978_s18, 3 }
   0xb   : > { %172 = sbr.rel (%p169_p6) target bundleno = 272 (0x110), region = 28  ;;  %331 = vmatprep.mubr.bf16.mxu0 (!%p169_p6), %v939_v2  ;;  %351 = vmatprep.mubr.bf16.mxu1 (!%p169_p6), %v939_v2  ;;  %v906_v3 = vld [vmem:[%s1057_s1 + $0x14] ss:$8 sps:$4 sm:$0xff] (!%p169_p6)   ;;  %v233_v4 = vld [vmem:[%s1057_s1 + $0x20] sm:$0x33] (!%p169_p6)  ;;  %p204_p7 = scmp.lt.s32.totalorder (!%p169_p6), %s756_s28, 63 }
   0xc   : > { %299 = vmatprep.subr.bf16.mxu0 (!%p169_p6), %v903_v0  ;;  %872 = vmatprep.subr.bf16.mxu1 (!%p169_p6), %v903_v0  ;;  %v908_v5 = vld [vmem:[%s1057_s1 + $0x10] ss:$8 sps:$4 sm:$0xff] (!%p169_p6)   ;;  %v771_v6 = vcombine.high (!%p169_p6), %v233_v4, %v233_v4  ;;  %v770_v7 = vcombine.low (!%p169_p6), %v233_v4, %v233_v4  ;;  %vm292_vm0 = vcmask (!%p169_p6), 1041408   ;;  %vm279_vm1 = vcmask (!%p169_p6), 293888   ;;  %s186_s13 = sand.u32 (!%p169_p6), 1, %s929_s15   ;;  %p210_p8 = scmp.lt.s32.totalorder (!%p169_p6), %s978_s18, 7 }
   0xd   : > { %300 = vmatpush1.bf16.msra.mxu0 (!%p169_p6), %v905_v1  ;;  %875 = vmatpush1.bf16.msra.mxu1 (!%p169_p6), %v905_v1  ;;  %s755_s14 = sshll.u32 (!%p169_p6), %s186_s13, 6 }
   0xe   : > { %301 = vmatprep.subr.bf16.mxu0 (!%p169_p6), %v906_v3  ;;  %873 = vmatprep.subr.bf16.mxu1 (!%p169_p6), %v906_v3  ;;  %v294_v8 = vsel (!%p169_p6), %vm292_vm0, %v770_v7, 0  ;;  %s1014_s17 = scalar_lea.vmem (!%p169_p6), [#allocation2], %s755_s14 }
  0x11   : > { %302 = vmatpush1.bf16.msra.mxu0 (!%p169_p6), %v908_v5  ;;  %876 = vmatpush1.bf16.msra.mxu1 (!%p169_p6), %v908_v5 }
  0x12   : > { %s1066_s28 = smov (!%p204_p7, %s756_s28), 63  ;;  %772 = vmatprep.subr.msk.bf16.mxu0 %vm292_vm0, %v771_v6  ;;  %874 = vmatprep.subr.msk.bf16.mxu1 %vm292_vm0, %v771_v6  ;;  %s824_s29 = sshll.u32 (%p990_p4), %s978_s18, 5 }
  0x13   : > { %s757_s9 = sshll.u32 %s1066_s28, 2  ;;  %s544_s6 = scalar_lea.vmem (%p990_p4), %s1058_s2, %s824_s29 }
  0x14   : > { %s207_s12 = scalar_lea.vmem %s1056_s0, %s757_s9 }
  0x15   : > { %v911_v9 = vld [vmem:[%s207_s12] sm:$0xff]   ;;  %v912_v10 = vld [vmem:[%s207_s12 + $0x10] sm:$0xff]   ;;  %304 = vmatpush1.bf16.msra.mxu0 %v294_v8  ;;  %877 = vmatpush1.bf16.msra.mxu1 %v294_v8  ;;  %v913_v11 = vld [vmem:[%s207_s12 + $0x8] sm:$0xff]   ;;  %s211_s15 = scalar_select %p210_p8, %s978_s18, 7 }
  0x16   : > { %v914_v12 = vld [vmem:[%s207_s12 + $0x18] sm:$0xff]  }
  0x17   : > { %s806_s20 = sshll.u32 %s211_s15, 4 }
  0x18   : > { %773 = vmatmul.mubr.msk.bf16.vlgmr.msra.gmra.mrb[0].mxu0 %vm279_vm1, %v911_v9  ;;  %775 = vmatmul.mubr.msk.bf16.vlgmr.msra.gmra.mrb[0].mxu1 %vm279_vm1, %v912_v10  ;;  %s214_s25 = scalar_lea.vmem %s1059_s3, %s806_s20  ;;  %s219_s28 = scalar_lea.vmem %s1060_s4, %s806_s20 }
  0x19   : > { %341 = vmatprep.mubr.bf16.mxu0 %v939_v2  ;;  %361 = vmatprep.mubr.bf16.mxu1 %v939_v2 }
  0x20   : > { %774 = vmatmul.mubr.msk.bf16.gmra.mrb[4].mxu0 %vm279_vm1, %v913_v11  ;;  %776 = vmatmul.mubr.msk.bf16.gmra.mrb[4].mxu1 %vm279_vm1, %v914_v12 }
  0xeb   : > { %v333_v13 = vpop.f32.mrb[0].mxu0  ;;  %v353_v14 = vpop.f32.mrb[0].mxu1 }
  0xec   : > { %v335_v15 = vpop.f32.mrb[1].mxu0  ;;  %v355_v16 = vpop.f32.mrb[1].mxu1  ;;  %v479_v17 = vmul.f32 %v333_v13, %v333_v13  ;;  %v487_v53 = vmul.f32 %v353_v14, %v353_v14 }
  0xed   : > { %v337_v18 = vpop.f32.mrb[2].mxu0  ;;  %v357_v19 = vpop.f32.mrb[2].mxu1  ;;  %v480_v26 = vmul.f32 %v335_v15, %v335_v15  ;;  %v488_v57 = vmul.f32 %v355_v16, %v355_v16 }
  0xee   : > { %v828_v20 = vpack.c.bf16 %v337_v18, %v333_v13  ;;  %v453_v21 = vadd.f32 %v337_v18, %v333_v13  ;;  %v481_v22 = vmul.f32 %v337_v18, %v337_v18  ;;  %v339_v23 = vpop.f32.mrb[3].mxu0  ;;  %v838_v24 = vpack.c.bf16 %v357_v19, %v353_v14  ;;  %v359_v25 = vpop.f32.mrb[3].mxu1 }
  0xef   : > { %v848_v27 = vpack.c.bf16 %v339_v23, %v335_v15  ;;  %v466_v28 = vadd.f32 %v339_v23, %v335_v15  ;;  %v482_v29 = vmul.f32 %v339_v23, %v339_v23  ;;  %v858_v31 = vpack.c.bf16 %v359_v25, %v355_v16 }
  0xf0   : > { %829 = vst [vmem:[%s1014_s17] sm:$0xff] %v828_v20   ;;  %v495_v30 = vadd.f32 %v481_v22, %v479_v17  ;;  %866 = vst [vmem:[%s1014_s17 + $0x10] sm:$0xff] %v838_v24   ;;  %v489_v61 = vmul.f32 %v357_v19, %v357_v19  ;;  %v490_v1 = vmul.f32 %v359_v25, %v359_v25 }
  0xf1   : > { %868 = vst [vmem:[%s1014_s17 + $0x20] sm:$0xff] %v848_v27   ;;  %v508_v32 = vadd.f32 %v482_v29, %v480_v26  ;;  %870 = vst [vmem:[%s1014_s17 + $0x30] sm:$0xff] %v858_v31  }
  0xf3   : > { %v343_v33 = vpop.f32.mrb[4].mxu0  ;;  %v363_v34 = vpop.f32.mrb[4].mxu1 }
  0xf4   : > { %v454_v35 = vadd.f32 %v453_v21, %v343_v33  ;;  %v483_v36 = vmul.f32 %v343_v33, %v343_v33  ;;  %v345_v37 = vpop.f32.mrb[5].mxu0  ;;  %v365_v38 = vpop.f32.mrb[5].mxu1  ;;  %v491_v0 = vmul.f32 %v363_v34, %v363_v34 }
  0xf5   : > { %v467_v39 = vadd.f32 %v466_v28, %v345_v37  ;;  %v484_v40 = vmul.f32 %v345_v37, %v345_v37  ;;  %v347_v41 = vpop.f32.mrb[6].mxu0  ;;  %v367_v42 = vpop.f32.mrb[6].mxu1  ;;  %v492_v4 = vmul.f32 %v365_v38, %v365_v38 }
  0xf6   : > { %v496_v43 = vadd.f32 %v495_v30, %v483_v36  ;;  %v833_v44 = vpack.c.bf16 %v347_v41, %v343_v33  ;;  %v455_v45 = vadd.f32 %v454_v35, %v347_v41  ;;  %v485_v46 = vmul.f32 %v347_v41, %v347_v41  ;;  %v349_v47 = vpop.f32.mrb[7].mxu0  ;;  %v369_v48 = vpop.f32.mrb[7].mxu1 }
  0xf7   : > { %v509_v49 = vadd.f32 %v508_v32, %v484_v40  ;;  %v853_v50 = vpack.c.bf16 %v349_v47, %v345_v37  ;;  %v468_v51 = vadd.f32 %v467_v39, %v349_v47  ;;  %v486_v52 = vmul.f32 %v349_v47, %v349_v47  ;;  %v560_v41 = vld [vmem:[%s1014_s17] sm:$0xff] (%p990_p4)  }
  0xf8   : > { %865 = vst [vmem:[%s1014_s17 + $0x8] sm:$0xff] %v833_v44   ;;  %v456_v54 = vadd.f32 %v455_v45, %v353_v14  ;;  %v497_v55 = vadd.f32 %v496_v43, %v485_v46  ;;  %v843_v56 = vpack.c.bf16 %v367_v42, %v363_v34  ;;  %v863_v60 = vpack.c.bf16 %v369_v48, %v365_v38  ;;  %v568_v43 = vld [vmem:[%s1014_s17 + $0x10] sm:$0xff] (%p990_p4)   ;;  %v576_v45 = vld [vmem:[%s1014_s17 + $0x20] sm:$0xff] (%p990_p4)  }
  0xf9   : > { %869 = vst [vmem:[%s1014_s17 + $0x28] sm:$0xff] %v853_v50   ;;  %v469_v58 = vadd.f32 %v468_v51, %v355_v16  ;;  %v510_v59 = vadd.f32 %v509_v49, %v486_v52  ;;  %v493_v11 = vmul.f32 %v367_v42, %v367_v42  ;;  %v494_v14 = vmul.f32 %v369_v48, %v369_v48  ;;  %v584_v47 = vld [vmem:[%s1014_s17 + $0x30] sm:$0xff] (%p990_p4)  }
  0xfa   : > { %v498_v62 = vadd.f32 %v497_v55, %v487_v53  ;;  %v457_v63 = vadd.f32 %v456_v54, %v357_v19  ;;  %867 = vst [vmem:[%s1014_s17 + $0x18] sm:$0xff] %v843_v56   ;;  %871 = vst [vmem:[%s1014_s17 + $0x38] sm:$0xff] %v863_v60  }
  0xfb   : > { %v511_v2 = vadd.f32 %v510_v59, %v488_v57  ;;  %v470_v3 = vadd.f32 %v469_v58, %v359_v25  ;;  %561 = vst [vmem:[%s544_s6] sm:$0xff] (%p990_p4), %v560_v41   ;;  %569 = vst [vmem:[%s544_s6 + $0x10] sm:$0xff] (%p990_p4), %v568_v43  }
  0xfc   : > { %v458_v5 = vadd.f32 %v457_v63, %v363_v34  ;;  %v499_v6 = vadd.f32 %v498_v62, %v489_v61  ;;  %577 = vst [vmem:[%s544_s6 + $0x100] sm:$0xff] (%p990_p4), %v576_v45   ;;  %585 = vst [vmem:[%s544_s6 + $0x110] sm:$0xff] (%p990_p4), %v584_v47  }
  0xfd   : > { %v471_v7 = vadd.f32 %v470_v3, %v365_v38  ;;  %v512_v8 = vadd.f32 %v511_v2, %v490_v1 }
  0xfe   : > { %v500_v9 = vadd.f32 %v499_v6, %v491_v0  ;;  %v459_v10 = vadd.f32 %v458_v5, %v367_v42 }
  0xff   : > { %v513_v12 = vadd.f32 %v512_v8, %v492_v4  ;;  %v472_v13 = vadd.f32 %v471_v7, %v369_v48  ;;  %v564_v42 = vld [vmem:[%s1014_s17 + $0x8] sm:$0xff] (%p990_p4)  }
 0x100   : > { %v460_v15 = vrot.slane %v459_v10, 4  ;;  %v501_v16 = vadd.f32 %v500_v9, %v493_v11  ;;  %v580_v46 = vld [vmem:[%s1014_s17 + $0x28] sm:$0xff] (%p990_p4)   ;;  %565 = vst [vmem:[%s544_s6 + $0x8] sm:$0xff] (%p990_p4), %v564_v42  }
 0x101   : > { %v473_v17 = vrot.slane %v472_v13, 4  ;;  %v514_v18 = vadd.f32 %v513_v12, %v494_v14  ;;  %v572_v44 = vld [vmem:[%s1014_s17 + $0x18] sm:$0xff] (%p990_p4)   ;;  %581 = vst [vmem:[%s544_s6 + $0x108] sm:$0xff] (%p990_p4), %v580_v46  }
 0x102   : > { %v461_v19 = vadd.f32 %v460_v15, %v459_v10  ;;  %v502_v20 = vrot.slane %v501_v16, 4  ;;  %573 = vst [vmem:[%s544_s6 + $0x18] sm:$0xff] (%p990_p4), %v572_v44   ;;  %v588_v48 = vld [vmem:[%s1014_s17 + $0x38] sm:$0xff] (%p990_p4)  }
 0x103   : > { %v474_v21 = vadd.f32 %v473_v17, %v472_v13  ;;  %v515_v22 = vrot.slane %v514_v18, 4  ;;  %589 = vst [vmem:[%s544_s6 + $0x118] sm:$0xff] (%p990_p4), %v588_v48  }
 0x104   : > { %v462_v23 = vrot.slane %v461_v19, 2  ;;  %v503_v24 = vadd.f32 %v502_v20, %v501_v16 }
 0x105   : > { %v475_v25 = vrot.slane %v474_v21, 2  ;;  %v516_v26 = vadd.f32 %v515_v22, %v514_v18 }
 0x106   : > { %v463_v27 = vadd.f32 %v462_v23, %v461_v19  ;;  %v504_v28 = vrot.slane %v503_v24, 2 }
 0x107   : > { %v476_v29 = vadd.f32 %v475_v25, %v474_v21  ;;  %v517_v30 = vrot.slane %v516_v26, 2 }
 0x108   : > { %v464_v31 = vrot.slane %v463_v27, 1  ;;  %v505_v32 = vadd.f32 %v504_v28, %v503_v24 }
 0x109   : > { %v477_v33 = vrot.slane %v476_v29, 1  ;;  %v518_v34 = vadd.f32 %v517_v30, %v516_v26  ;;  %541 = sbr.rel (!%p990_p4) target bundleno = 272 (0x110), region = 32 }
 0x10a   : > { %v465_v35 = vadd.f32 %v464_v31, %v463_v27  ;;  %v506_v36 = vrot.slane %v505_v32, 1 }
 0x10b   : > { %v478_v37 = vadd.f32 %v477_v33, %v476_v29  ;;  %v519_v38 = vrot.slane %v518_v34, 1 }
 0x10c   : > { %v507_v39 = vadd.f32 %v506_v36, %v505_v32  ;;  %521 = vst [vmem:[%s214_s25] sm:$0xff] %v465_v35 }
 0x10d   : > { %v520_v40 = vadd.f32 %v519_v38, %v518_v34  ;;  %522 = vst [vmem:[%s214_s25 + $0x8] sm:$0xff] %v478_v37 }
 0x10e   : > { %523 = vst [vmem:[%s219_s28] sm:$0xff] %v507_v39 }
 0x10f   : > { %524 = vst [vmem:[%s219_s28 + $0x8] sm:$0xff] %v520_v40 }
 0x110 PF: > { %p12_p9 = scmp.ge.s32.totalorder %s980_s19, 10   ;;  %s1062_s15 = smov %s933_s16 }
 0x111   : > { %s1063_s16 = smov %s988_s22  ;;  %s1064_s17 = smov %s980_s19 }
 0x112   :  { %14 = sbr.rel (!%p12_p9) target bundleno = 2 (0x2), region = 124 }

// kernel: st_feature_extraction_forward.4
= control target key start
LH: loop header
LB: loop body
LE: loop exit
PB: predicated region body
PF: predicated region fallthrough
CT: control target
= control target key end

     0   :  { %s965_s15 = smov 0   ;;  %s967_s16 = smov 0   ;;  %s1056_s0 = inlined_call_operand.vmem [shape: bf16[256,36], index: 0, kind: input, shape index: {}]   ;;  %s1057_s1 = inlined_call_operand.vmem [shape: bf16[36,256], index: 1, kind: input, shape index: {}]   ;;  %s1058_s2 = inlined_call_operand.vmem [shape: bf16[2,256,128], index: 2, kind: output, shape index: {0}]   ;;  %s1059_s3 = inlined_call_operand.vmem [shape: f32[32,256], index: 3, kind: output, shape index: {1}]   ;;  %s1060_s4 = inlined_call_operand.vmem [shape: f32[32,256], index: 4, kind: output, shape index: {2}]  }
   0x1   :  { %s969_s17 = smov 0  }
   0x2 LB: > { %s978_s18 = sadd.s32 4294967295, %s937_s17   ;;  %s980_s19 = sadd.s32 1, %s937_s17   ;;  %s937_s17 = sphi %s969_s17, %s1064_s17   ;;  %s933_s16 = sphi %s967_s16, %s1063_s16   ;;  %s929_s15 = sphi %s965_s15, %s1062_s15  }
   0x3   : > { %s66_s20 = ssub.s32 %s937_s17, %s980_s19  ;;  %s69_s21 = sadd.s32 1, %s933_s16 }
   0x4   : > { %p67_p0 = scmp.eq.s32.totalorder %s66_s20, 0  ;;  %p79_p1 = scmp.ne.s32.totalorder %s933_s16, %s929_s15 }
   0x5   : > { %p80_p2 = scmp.eq.s32.totalorder %s978_s18, 3  ;;  %p754_p3 = scmp.ge.s32.totalorder %s937_s17, 1 }
   0x6   : > { %s988_s22 = scalar_select %p67_p0, %s933_s16, %s69_s21  }
   0x7   : > { %p990_p4 = por %p80_p2, %p79_p1  ;;  %p168_p5 = scmp.lt.s32.totalorder %s937_s17, 5 }
   0x9   : > { %p169_p6 = pnand %p754_p3, %p168_p5 }
   0xa   : > { %v903_v0 = vld [vmem:[%s1057_s1 + $0x4] ss:$8 sps:$4 sm:$0xff] (!%p169_p6)   ;;  %v905_v1 = vld [vmem:[%s1057_s1] ss:$8 sps:$4 sm:$0xff] (!%p169_p6)   ;;  %v939_v2 = vmov (!%p169_p6), 0   ;;  %s756_s28 = sshll.u32 (!%p169_p6), %s978_s18, 3 }
   0xb   : > { %172 = sbr.rel (%p169_p6) target bundleno = 272 (0x110), region = 28  ;;  %331 = vmatprep.mubr.bf16.mxu0 (!%p169_p6), %v939_v2  ;;  %351 = vmatprep.mubr.bf16.mxu1 (!%p169_p6), %v939_v2  ;;  %v906_v3 = vld [vmem:[%s1057_s1 + $0x14] ss:$8 sps:$4 sm:$0xff] (!%p169_p6)   ;;  %v233_v4 = vld [vmem:[%s1057_s1 + $0x20] sm:$0x33] (!%p169_p6)  ;;  %p204_p7 = scmp.lt.s32.totalorder (!%p169_p6), %s756_s28, 31 }
   0xc   : > { %299 = vmatprep.subr.bf16.mxu0 (!%p169_p6), %v903_v0  ;;  %872 = vmatprep.subr.bf16.mxu1 (!%p169_p6), %v903_v0  ;;  %v908_v5 = vld [vmem:[%s1057_s1 + $0x10] ss:$8 sps:$4 sm:$0xff] (!%p169_p6)   ;;  %v771_v6 = vcombine.high (!%p169_p6), %v233_v4, %v233_v4  ;;  %v770_v7 = vcombine.low (!%p169_p6), %v233_v4, %v233_v4  ;;  %vm292_vm0 = vcmask (!%p169_p6), 1041408   ;;  %vm279_vm1 = vcmask (!%p169_p6), 293888   ;;  %s186_s13 = sand.u32 (!%p169_p6), 1, %s929_s15   ;;  %p210_p8 = scmp.lt.s32.totalorder (!%p169_p6), %s978_s18, 3 }
   0xd   : > { %300 = vmatpush1.bf16.msra.mxu0 (!%p169_p6), %v905_v1  ;;  %875 = vmatpush1.bf16.msra.mxu1 (!%p169_p6), %v905_v1  ;;  %s755_s14 = sshll.u32 (!%p169_p6), %s186_s13, 6 }
   0xe   : > { %301 = vmatprep.subr.bf16.mxu0 (!%p169_p6), %v906_v3  ;;  %873 = vmatprep.subr.bf16.mxu1 (!%p169_p6), %v906_v3  ;;  %v294_v8 = vsel (!%p169_p6), %vm292_vm0, %v770_v7, 0  ;;  %s1014_s17 = scalar_lea.vmem (!%p169_p6), [#allocation2], %s755_s14 }
  0x11   : > { %302 = vmatpush1.bf16.msra.mxu0 (!%p169_p6), %v908_v5  ;;  %876 = vmatpush1.bf16.msra.mxu1 (!%p169_p6), %v908_v5 }
  0x12   : > { %s1066_s28 = smov (!%p204_p7, %s756_s28), 31  ;;  %772 = vmatprep.subr.msk.bf16.mxu0 %vm292_vm0, %v771_v6  ;;  %874 = vmatprep.subr.msk.bf16.mxu1 %vm292_vm0, %v771_v6  ;;  %s824_s29 = sshll.u32 (%p990_p4), %s978_s18, 5 }
  0x13   : > { %s757_s9 = sshll.u32 %s1066_s28, 2  ;;  %s544_s6 = scalar_lea.vmem (%p990_p4), %s1058_s2, %s824_s29 }
  0x14   : > { %s207_s12 = scalar_lea.vmem %s1056_s0, %s757_s9 }
  0x15   : > { %v911_v9 = vld [vmem:[%s207_s12] sm:$0xff]   ;;  %v912_v10 = vld [vmem:[%s207_s12 + $0x10] sm:$0xff]   ;;  %304 = vmatpush1.bf16.msra.mxu0 %v294_v8  ;;  %877 = vmatpush1.bf16.msra.mxu1 %v294_v8  ;;  %v913_v11 = vld [vmem:[%s207_s12 + $0x8] sm:$0xff]   ;;  %s211_s15 = scalar_select %p210_p8, %s978_s18, 3 }
  0x16   : > { %v914_v12 = vld [vmem:[%s207_s12 + $0x18] sm:$0xff]  }
  0x17   : > { %s806_s20 = sshll.u32 %s211_s15, 4 }
  0x18   : > { %773 = vmatmul.mubr.msk.bf16.vlgmr.msra.gmra.mrb[0].mxu0 %vm279_vm1, %v911_v9  ;;  %775 = vmatmul.mubr.msk.bf16.vlgmr.msra.gmra.mrb[0].mxu1 %vm279_vm1, %v912_v10  ;;  %s214_s25 = scalar_lea.vmem %s1059_s3, %s806_s20  ;;  %s219_s28 = scalar_lea.vmem %s1060_s4, %s806_s20 }
  0x19   : > { %341 = vmatprep.mubr.bf16.mxu0 %v939_v2  ;;  %361 = vmatprep.mubr.bf16.mxu1 %v939_v2 }
  0x20   : > { %774 = vmatmul.mubr.msk.bf16.gmra.mrb[4].mxu0 %vm279_vm1, %v913_v11  ;;  %776 = vmatmul.mubr.msk.bf16.gmra.mrb[4].mxu1 %vm279_vm1, %v914_v12 }
  0xeb   : > { %v333_v13 = vpop.f32.mrb[0].mxu0  ;;  %v353_v14 = vpop.f32.mrb[0].mxu1 }
  0xec   : > { %v335_v15 = vpop.f32.mrb[1].mxu0  ;;  %v355_v16 = vpop.f32.mrb[1].mxu1  ;;  %v479_v17 = vmul.f32 %v333_v13, %v333_v13  ;;  %v487_v53 = vmul.f32 %v353_v14, %v353_v14 }
  0xed   : > { %v337_v18 = vpop.f32.mrb[2].mxu0  ;;  %v357_v19 = vpop.f32.mrb[2].mxu1  ;;  %v480_v26 = vmul.f32 %v335_v15, %v335_v15  ;;  %v488_v57 = vmul.f32 %v355_v16, %v355_v16 }
  0xee   : > { %v828_v20 = vpack.c.bf16 %v337_v18, %v333_v13  ;;  %v453_v21 = vadd.f32 %v337_v18, %v333_v13  ;;  %v481_v22 = vmul.f32 %v337_v18, %v337_v18  ;;  %v339_v23 = vpop.f32.mrb[3].mxu0  ;;  %v838_v24 = vpack.c.bf16 %v357_v19, %v353_v14  ;;  %v359_v25 = vpop.f32.mrb[3].mxu1 }
  0xef   : > { %v848_v27 = vpack.c.bf16 %v339_v23, %v335_v15  ;;  %v466_v28 = vadd.f32 %v339_v23, %v335_v15  ;;  %v482_v29 = vmul.f32 %v339_v23, %v339_v23  ;;  %v858_v31 = vpack.c.bf16 %v359_v25, %v355_v16 }
  0xf0   : > { %829 = vst [vmem:[%s1014_s17] sm:$0xff] %v828_v20   ;;  %v495_v30 = vadd.f32 %v481_v22, %v479_v17  ;;  %866 = vst [vmem:[%s1014_s17 + $0x10] sm:$0xff] %v838_v24   ;;  %v489_v61 = vmul.f32 %v357_v19, %v357_v19  ;;  %v490_v1 = vmul.f32 %v359_v25, %v359_v25 }
  0xf1   : > { %868 = vst [vmem:[%s1014_s17 + $0x20] sm:$0xff] %v848_v27   ;;  %v508_v32 = vadd.f32 %v482_v29, %v480_v26  ;;  %870 = vst [vmem:[%s1014_s17 + $0x30] sm:$0xff] %v858_v31  }
  0xf3   : > { %v343_v33 = vpop.f32.mrb[4].mxu0  ;;  %v363_v34 = vpop.f32.mrb[4].mxu1 }
  0xf4   : > { %v454_v35 = vadd.f32 %v453_v21, %v343_v33  ;;  %v483_v36 = vmul.f32 %v343_v33, %v343_v33  ;;  %v345_v37 = vpop.f32.mrb[5].mxu0  ;;  %v365_v38 = vpop.f32.mrb[5].mxu1  ;;  %v491_v0 = vmul.f32 %v363_v34, %v363_v34 }
  0xf5   : > { %v467_v39 = vadd.f32 %v466_v28, %v345_v37  ;;  %v484_v40 = vmul.f32 %v345_v37, %v345_v37  ;;  %v347_v41 = vpop.f32.mrb[6].mxu0  ;;  %v367_v42 = vpop.f32.mrb[6].mxu1  ;;  %v492_v4 = vmul.f32 %v365_v38, %v365_v38 }
  0xf6   : > { %v496_v43 = vadd.f32 %v495_v30, %v483_v36  ;;  %v833_v44 = vpack.c.bf16 %v347_v41, %v343_v33  ;;  %v455_v45 = vadd.f32 %v454_v35, %v347_v41  ;;  %v485_v46 = vmul.f32 %v347_v41, %v347_v41  ;;  %v349_v47 = vpop.f32.mrb[7].mxu0  ;;  %v369_v48 = vpop.f32.mrb[7].mxu1 }
  0xf7   : > { %v509_v49 = vadd.f32 %v508_v32, %v484_v40  ;;  %v853_v50 = vpack.c.bf16 %v349_v47, %v345_v37  ;;  %v468_v51 = vadd.f32 %v467_v39, %v349_v47  ;;  %v486_v52 = vmul.f32 %v349_v47, %v349_v47  ;;  %v560_v41 = vld [vmem:[%s1014_s17] sm:$0xff] (%p990_p4)  }
  0xf8   : > { %865 = vst [vmem:[%s1014_s17 + $0x8] sm:$0xff] %v833_v44   ;;  %v456_v54 = vadd.f32 %v455_v45, %v353_v14  ;;  %v497_v55 = vadd.f32 %v496_v43, %v485_v46  ;;  %v843_v56 = vpack.c.bf16 %v367_v42, %v363_v34  ;;  %v863_v60 = vpack.c.bf16 %v369_v48, %v365_v38  ;;  %v568_v43 = vld [vmem:[%s1014_s17 + $0x10] sm:$0xff] (%p990_p4)   ;;  %v576_v45 = vld [vmem:[%s1014_s17 + $0x20] sm:$0xff] (%p990_p4)  }
  0xf9   : > { %869 = vst [vmem:[%s1014_s17 + $0x28] sm:$0xff] %v853_v50   ;;  %v469_v58 = vadd.f32 %v468_v51, %v355_v16  ;;  %v510_v59 = vadd.f32 %v509_v49, %v486_v52  ;;  %v493_v11 = vmul.f32 %v367_v42, %v367_v42  ;;  %v494_v14 = vmul.f32 %v369_v48, %v369_v48  ;;  %v584_v47 = vld [vmem:[%s1014_s17 + $0x30] sm:$0xff] (%p990_p4)  }
  0xfa   : > { %v498_v62 = vadd.f32 %v497_v55, %v487_v53  ;;  %v457_v63 = vadd.f32 %v456_v54, %v357_v19  ;;  %867 = vst [vmem:[%s1014_s17 + $0x18] sm:$0xff] %v843_v56   ;;  %871 = vst [vmem:[%s1014_s17 + $0x38] sm:$0xff] %v863_v60  }
  0xfb   : > { %v511_v2 = vadd.f32 %v510_v59, %v488_v57  ;;  %v470_v3 = vadd.f32 %v469_v58, %v359_v25  ;;  %561 = vst [vmem:[%s544_s6] sm:$0xff] (%p990_p4), %v560_v41   ;;  %569 = vst [vmem:[%s544_s6 + $0x10] sm:$0xff] (%p990_p4), %v568_v43  }
  0xfc   : > { %v458_v5 = vadd.f32 %v457_v63, %v363_v34  ;;  %v499_v6 = vadd.f32 %v498_v62, %v489_v61  ;;  %577 = vst [vmem:[%s544_s6 + $0x80] sm:$0xff] (%p990_p4), %v576_v45   ;;  %585 = vst [vmem:[%s544_s6 + $0x90] sm:$0xff] (%p990_p4), %v584_v47  }
  0xfd   : > { %v471_v7 = vadd.f32 %v470_v3, %v365_v38  ;;  %v512_v8 = vadd.f32 %v511_v2, %v490_v1 }
  0xfe   : > { %v500_v9 = vadd.f32 %v499_v6, %v491_v0  ;;  %v459_v10 = vadd.f32 %v458_v5, %v367_v42 }
  0xff   : > { %v513_v12 = vadd.f32 %v512_v8, %v492_v4  ;;  %v472_v13 = vadd.f32 %v471_v7, %v369_v48  ;;  %v564_v42 = vld [vmem:[%s1014_s17 + $0x8] sm:$0xff] (%p990_p4)  }
 0x100   : > { %v460_v15 = vrot.slane %v459_v10, 4  ;;  %v501_v16 = vadd.f32 %v500_v9, %v493_v11  ;;  %v580_v46 = vld [vmem:[%s1014_s17 + $0x28] sm:$0xff] (%p990_p4)   ;;  %565 = vst [vmem:[%s544_s6 + $0x8] sm:$0xff] (%p990_p4), %v564_v42  }
 0x101   : > { %v473_v17 = vrot.slane %v472_v13, 4  ;;  %v514_v18 = vadd.f32 %v513_v12, %v494_v14  ;;  %v572_v44 = vld [vmem:[%s1014_s17 + $0x18] sm:$0xff] (%p990_p4)   ;;  %581 = vst [vmem:[%s544_s6 + $0x88] sm:$0xff] (%p990_p4), %v580_v46  }
 0x102   : > { %v461_v19 = vadd.f32 %v460_v15, %v459_v10  ;;  %v502_v20 = vrot.slane %v501_v16, 4  ;;  %573 = vst [vmem:[%s544_s6 + $0x18] sm:$0xff] (%p990_p4), %v572_v44   ;;  %v588_v48 = vld [vmem:[%s1014_s17 + $0x38] sm:$0xff] (%p990_p4)  }
 0x103   : > { %v474_v21 = vadd.f32 %v473_v17, %v472_v13  ;;  %v515_v22 = vrot.slane %v514_v18, 4  ;;  %589 = vst [vmem:[%s544_s6 + $0x98] sm:$0xff] (%p990_p4), %v588_v48  }
 0x104   : > { %v462_v23 = vrot.slane %v461_v19, 2  ;;  %v503_v24 = vadd.f32 %v502_v20, %v501_v16 }
 0x105   : > { %v475_v25 = vrot.slane %v474_v21, 2  ;;  %v516_v26 = vadd.f32 %v515_v22, %v514_v18 }
 0x106   : > { %v463_v27 = vadd.f32 %v462_v23, %v461_v19  ;;  %v504_v28 = vrot.slane %v503_v24, 2 }
 0x107   : > { %v476_v29 = vadd.f32 %v475_v25, %v474_v21  ;;  %v517_v30 = vrot.slane %v516_v26, 2 }
 0x108   : > { %v464_v31 = vrot.slane %v463_v27, 1  ;;  %v505_v32 = vadd.f32 %v504_v28, %v503_v24 }
 0x109   : > { %v477_v33 = vrot.slane %v476_v29, 1  ;;  %v518_v34 = vadd.f32 %v517_v30, %v516_v26  ;;  %541 = sbr.rel (!%p990_p4) target bundleno = 272 (0x110), region = 32 }
 0x10a   : > { %v465_v35 = vadd.f32 %v464_v31, %v463_v27  ;;  %v506_v36 = vrot.slane %v505_v32, 1 }
 0x10b   : > { %v478_v37 = vadd.f32 %v477_v33, %v476_v29  ;;  %v519_v38 = vrot.slane %v518_v34, 1 }
 0x10c   : > { %v507_v39 = vadd.f32 %v506_v36, %v505_v32  ;;  %521 = vst [vmem:[%s214_s25] sm:$0xff] %v465_v35 }
 0x10d   : > { %v520_v40 = vadd.f32 %v519_v38, %v518_v34  ;;  %522 = vst [vmem:[%s214_s25 + $0x8] sm:$0xff] %v478_v37 }
 0x10e   : > { %523 = vst [vmem:[%s219_s28] sm:$0xff] %v507_v39 }
 0x10f   : > { %524 = vst [vmem:[%s219_s28 + $0x8] sm:$0xff] %v520_v40 }
 0x110 PF: > { %p12_p9 = scmp.ge.s32.totalorder %s980_s19, 6   ;;  %s1062_s15 = smov %s933_s16 }
 0x111   : > { %s1063_s16 = smov %s988_s22  ;;  %s1064_s17 = smov %s980_s19 }
 0x112   :  { %14 = sbr.rel (!%p12_p9) target bundleno = 2 (0x2), region = 124 }

// kernel: st_feature_extraction_forward.5
= control target key start
LH: loop header
LB: loop body
LE: loop exit
PB: predicated region body
PF: predicated region fallthrough
CT: control target
= control target key end

     0   :  { %s915_s12 = smov 0   ;;  %s917_s13 = smov 0   ;;  %s1099_s0 = inlined_call_operand.vmem [shape: bf16[2,512,128], index: 0, kind: input, shape index: {}]   ;;  %s1100_s1 = inlined_call_operand.vmem [shape: bf16[2,256,128], index: 1, kind: input, shape index: {}]   ;;  %s1101_s2 = inlined_call_operand.vmem [shape: f32[2,8,128], index: 2, kind: input, shape index: {}]   ;;  %s1102_s3 = inlined_call_operand.vmem [shape: f32[512,128], index: 3, kind: output, shape index: {}]  }
   0x1   :  { %s919_s14 = smov 0   ;;  %s921_s15 = smov 0  }
   0x2   :  { %s923_s16 = smov 0   ;;  %s925_s17 = smov 0  }
   0x3   :  { %s927_s18 = smov 0   ;;  %s929_s19 = smov 0  }
   0x4   :  { %s931_s20 = smov 0  }
   0x5 LB: > { %s25_s21 = sadd.s32 1, %s881_s17  ;;  %s28_s23 = sadd.s32 1, %s885_s18  ;;  %s893_s20 = sphi %s931_s20, %s13_s20   ;;  %s889_s19 = sphi %s929_s19, %s1112_s19   ;;  %s885_s18 = sphi %s927_s18, %s1111_s18   ;;  %s881_s17 = sphi %s925_s17, %s1110_s17   ;;  %s877_s16 = sphi %s923_s16, %s1109_s16   ;;  %s873_s15 = sphi %s921_s15, %s1108_s15   ;;  %s869_s14 = sphi %s919_s14, %s1107_s14   ;;  %s865_s13 = sphi %s917_s13, %s1106_s13   ;;  %s861_s12 = sphi %s915_s12, %s1105_s12  }
   0x6   : > { %p961_p0 = scmp.ge.s32.totalorder %s25_s21, 2  ;;  %s32_s24 = sadd.s32 1, %s889_s19 }
   0x7   : > { %s650_s25 = sshll.u32 %s889_s19, 1  ;;  %p54_p2 = scmp.ne.s32.totalorder %s865_s13, %s861_s12 }
   0x8   : > { %s1114_s23 = smov (!%p961_p0, %s28_s23), %s885_s18  ;;  %p55_p3 = scmp.eq.s32.totalorder %s893_s20, 0 }
   0x9   : > { %p30_p1 = scmp.ge.s32.totalorder %s1114_s23, 2  ;;  %s37_s26 = sadd.s32 %s885_s18, %s650_s25 }
   0xa   : > { %p976_p4 = por %p55_p3, %p54_p2  ;;  %s651_s28 = sshll.u32 %s37_s26, 1 }
   0xb   : > { %s1116_s24 = smov (!%p30_p1, %s32_s24), %s889_s19  ;;  %s1118_s23 = smov (%p30_p1, %s1114_s23), 0 }
   0xc   : > { %p34_p5 = scmp.ge.s32.totalorder %s1116_s24, 2  ;;  %s1122_s21 = smov (%p961_p0, %s25_s21), 0 }
   0xd   : > { %s39_s30 = sadd.s32 %s881_s17, %s651_s28  ;;  %s47_s8 = sadd.s32 1, %s865_s13 }
   0xe   : > { %s1120_s24 = smov (%p34_p5, %s1116_s24), 0  ;;  %p661_p7 = scmp.ge.s32.totalorder %s893_s20, 8 }
   0xf   : > { %s652_s29 = sshll.u32 %s1120_s24, 1 }
  0x10   : > { %s41_s4 = sadd.s32 %s652_s29, %s1118_s23  ;;  %172 = sbr.rel (%p661_p7) target bundleno = 31 (0x1f), region = 16 }
  0x11   : > { %s653_s5 = sshll.u32 %s41_s4, 1 }
  0x12   : > { %s43_s6 = sadd.s32 %s653_s5, %s1122_s21 }
  0x13   : > { %s44_s7 = ssub.s32 %s39_s30, %s43_s6 }
  0x14   : > { %p45_p6 = scmp.eq.s32.totalorder %s44_s7, 0 }
  0x16   : > { %s994_s9 = scalar_select %p45_p6, %s865_s13, %s47_s8  }
  0x17   : > { %175 = sbr.rel (!%p976_p4) target bundleno = 31 (0x1f), region = 20  ;;  %s177_s10 = sand.u32 (%p976_p4), 1, %s865_s13  }
  0x18   : > { %s692_s11 = sshll.u32 (%p976_p4), %s39_s30, 5  ;;  %s662_s22 = sshll.u32 (%p976_p4), %s177_s10, 6 }
  0x19   : > { %s186_s28 = scalar_lea.vmem (%p976_p4), %s1099_s0, %s692_s11  ;;  %s179_s29 = scalar_lea.vmem (%p976_p4), [#allocation2], %s662_s22 }
  0x1a   : > { %v202_v0 = vld [vmem:[%s186_s28] sm:$0xff] (%p976_p4)   ;;  %v206_v1 = vld [vmem:[%s186_s28 + $0x8] sm:$0xff] (%p976_p4)   ;;  %v210_v2 = vld [vmem:[%s186_s28 + $0x10] sm:$0xff] (%p976_p4)  }
  0x1b   : > { %203 = vst [vmem:[%s179_s29] sm:$0xff] (%p976_p4), %v202_v0   ;;  %207 = vst [vmem:[%s179_s29 + $0x8] sm:$0xff] (%p976_p4), %v206_v1   ;;  %v214_v3 = vld [vmem:[%s186_s28 + $0x18] sm:$0xff] (%p976_p4)   ;;  %v218_v4 = vld [vmem:[%s186_s28 + $0x100] sm:$0xff] (%p976_p4)  }
  0x1c   : > { %211 = vst [vmem:[%s179_s29 + $0x10] sm:$0xff] (%p976_p4), %v210_v2   ;;  %v222_v5 = vld [vmem:[%s186_s28 + $0x108] sm:$0xff] (%p976_p4)   ;;  %215 = vst [vmem:[%s179_s29 + $0x18] sm:$0xff] (%p976_p4), %v214_v3   ;;  %v226_v6 = vld [vmem:[%s186_s28 + $0x110] sm:$0xff] (%p976_p4)  }
  0x1d   : > { %219 = vst [vmem:[%s179_s29 + $0x20] sm:$0xff] (%p976_p4), %v218_v4   ;;  %223 = vst [vmem:[%s179_s29 + $0x28] sm:$0xff] (%p976_p4), %v222_v5   ;;  %v230_v7 = vld [vmem:[%s186_s28 + $0x118] sm:$0xff] (%p976_p4)  }
  0x1e   : > { %227 = vst [vmem:[%s179_s29 + $0x30] sm:$0xff] %v226_v6   ;;  %231 = vst [vmem:[%s179_s29 + $0x38] sm:$0xff] %v230_v7  }
  0x1f PF: > { %p667_p8 = scmp.ge.s32.totalorder %s893_s20, 1  ;;  %p311_p9 = scmp.lt.s32.totalorder %s893_s20, 9 }
  0x21   : > { %p312_p10 = pnand %p667_p8, %p311_p9 }
  0x22   : > { %s318_s27 = sand.u32 (!%p312_p10), 1, %s861_s12   ;;  %s669_s30 = sshll.u32 (!%p312_p10), %s877_s16, 1 }
  0x23   : > { %315 = sbr.rel (%p312_p10) target bundleno = 68 (0x44), region = 69  ;;  %s668_s4 = sshll.u32 (!%p312_p10), %s318_s27, 6 }
  0x24   : > { %s366_s5 = sadd.s32 (!%p312_p10), %s869_s14, %s669_s30  ;;  %p368_p11 = scmp.lt.s32.totalorder (!%p312_p10), %s873_s15, 1 }
  0x25   : > { %s670_s6 = sshll.u32 (!%p312_p10), %s366_s5, 3  ;;  %s320_s7 = scalar_lea.vmem (!%p312_p10), [#allocation2], %s668_s4 }
  0x26   : > { %p370_p12 = scmp.lt.s32.totalorder (!%p312_p10), %s670_s6, 31  ;;  %v694_v8 = vld [vmem:[%s320_s7] sm:$0xff] (!%p312_p10)   ;;  %v741_v9 = vld [vmem:[%s320_s7 + $0x8] sm:$0xff] (!%p312_p10)   ;;  %s1010_s8 = sadd.s32 (!%p312_p10), %s873_s15, %s669_s30  ;;  %v742_v12 = vld [vmem:[%s320_s7 + $0x10] sm:$0xff] (!%p312_p10)  }
  0x27   : > { %v744_v10 = vld [vmem:[%s320_s7 + $0x20] sm:$0xff] (!%p312_p10)   ;;  %v745_v11 = vld [vmem:[%s320_s7 + $0x28] sm:$0xff] (!%p312_p10)   ;;  %v746_v13 = vld [vmem:[%s320_s7 + $0x30] sm:$0xff] (!%p312_p10)   ;;  %v695_v14 = vunpack.c.l.bf16 (!%p312_p10), %v694_v8  ;;  %v696_v15 = vunpack.c.h.bf16 (!%p312_p10), %v694_v8  ;;  %v699_v16 = vunpack.c.l.bf16 (!%p312_p10), %v741_v9  ;;  %v700_v17 = vunpack.c.h.bf16 (!%p312_p10), %v741_v9 }
  0x28   : > { %v1013_v18 = vld [vmem:[%s320_s7 + $0x18] sm:$0xff] (!%p312_p10)   ;;  %v711_v20 = vunpack.c.l.bf16 (!%p312_p10), %v744_v10  ;;  %v712_v21 = vunpack.c.h.bf16 (!%p312_p10), %v744_v10  ;;  %v715_v22 = vunpack.c.l.bf16 (!%p312_p10), %v745_v11  ;;  %v716_v23 = vunpack.c.h.bf16 (!%p312_p10), %v745_v11 }
  0x29   : > { %v1015_v19 = vld [vmem:[%s320_s7 + $0x38] sm:$0xff] (!%p312_p10)   ;;  %v703_v24 = vunpack.c.l.bf16 (!%p312_p10), %v742_v12  ;;  %v719_v25 = vunpack.c.l.bf16 (!%p312_p10), %v746_v13  ;;  %v704_v26 = vunpack.c.h.bf16 (!%p312_p10), %v742_v12  ;;  %v720_v27 = vunpack.c.h.bf16 (!%p312_p10), %v746_v13 }
  0x2a   : > { %s1124_s15 = smov (!%p368_p11, %s873_s15), 1  ;;  %s1126_s6 = smov (!%p370_p12, %s670_s6), 31  ;;  %v707_v29 = vunpack.c.l.bf16 %v1013_v18  ;;  %v723_v30 = vunpack.c.l.bf16 %v1015_v19  ;;  %v708_v31 = vunpack.c.h.bf16 %v1013_v18  ;;  %v724_v32 = vunpack.c.h.bf16 %v1015_v19 }
  0x2b   : > { %s671_s12 = sshll.u32 %s1124_s15, 5  ;;  %s673_s16 = sshll.u32 %s1124_s15, 3 }
  0x2c   : > { %s373_s10 = sadd.s32 %s671_s12, %s1126_s6  ;;  %s1020_s25 = scalar_lea.vmem %s1101_s2, %s673_s16 }
  0x2d   : > { %s672_s26 = sshll.u32 %s373_s10, 2  ;;  %s675_s15 = sshll.u32 %s1010_s8, 1  ;;  %v1024_v28 = vld [vmem:[%s1020_s25 + $0x1] ss:$0 sm:$0xff]  ;;  %v1035_v33 = vld [vmem:[%s1020_s25] ss:$0 sm:$0xff] }
  0x2e   : > { %s375_s27 = scalar_lea.vmem %s1100_s1, %s672_s26  ;;  %s386_s30 = sadd.s32 %s869_s14, %s675_s15  ;;  %v1038_v34 = vld [vmem:[%s1020_s25 + $0x2] ss:$0 sm:$0xff]  ;;  %v466_v35 = vmul.f32 %v695_v14, %v1024_v28  ;;  %v467_v36 = vmul.f32 %v696_v15, %v1024_v28  ;;  %v468_v37 = vmul.f32 %v699_v16, %v1024_v28  ;;  %v469_v38 = vmul.f32 %v700_v17, %v1024_v28  ;;  %v689_v3 = vld [vmem:[%s1020_s25 + $0x3] ss:$0 sm:$0xff] }
  0x2f   : > { %s676_s4 = sshll.u32 %s386_s30, 3  ;;  %v726_v39 = vld [vmem:[%s375_s27] sm:$0xff]   ;;  %v486_v40 = vmul.f32 %v711_v20, %v1038_v34  ;;  %v487_v41 = vmul.f32 %v712_v21, %v1038_v34  ;;  %v748_v42 = vld [vmem:[%s375_s27 + $0x8] sm:$0xff]   ;;  %v488_v43 = vmul.f32 %v715_v22, %v1038_v34  ;;  %v489_v44 = vmul.f32 %v716_v23, %v1038_v34  ;;  %v749_v45 = vld [vmem:[%s375_s27 + $0x10] sm:$0xff]  }
  0x30   : > { %p388_p13 = scmp.lt.s32.totalorder %s676_s4, 63  ;;  %v727_v46 = vunpack.c.l.bf16 %v726_v39  ;;  %v728_v47 = vunpack.c.h.bf16 %v726_v39  ;;  %v731_v48 = vunpack.c.l.bf16 %v748_v42  ;;  %v732_v49 = vunpack.c.h.bf16 %v748_v42  ;;  %v750_v58 = vld [vmem:[%s375_s27 + $0x18] sm:$0xff]  }
  0x31   : > { %v735_v50 = vunpack.c.l.bf16 %v749_v45  ;;  %v470_v51 = vmul.f32 %v703_v24, %v1024_v28  ;;  %v490_v52 = vmul.f32 %v719_v25, %v1038_v34  ;;  %v736_v53 = vunpack.c.h.bf16 %v749_v45 }
  0x32   : > { %s1128_s4 = smov (!%p388_p13, %s676_s4), 63  ;;  %v454_v54 = vmul.f32 %v727_v46, %v1035_v33  ;;  %v455_v55 = vmul.f32 %v728_v47, %v1035_v33  ;;  %v456_v56 = vmul.f32 %v731_v48, %v1035_v33  ;;  %v457_v57 = vmul.f32 %v732_v49, %v1035_v33 }
  0x33   : > { %v458_v59 = vmul.f32 %v735_v50, %v1035_v33  ;;  %v459_v60 = vmul.f32 %v736_v53, %v1035_v33  ;;  %v471_v61 = vmul.f32 %v704_v26, %v1024_v28  ;;  %v491_v62 = vmul.f32 %v720_v27, %v1038_v34  ;;  %s677_s14 = sshll.u32 %s1128_s4, 3 }
  0x34   : > { %v474_v63 = vadd.f32 %v466_v35, %v454_v54  ;;  %v475_v0 = vadd.f32 %v467_v36, %v455_v55  ;;  %v476_v1 = vadd.f32 %v468_v37, %v456_v56  ;;  %v477_v2 = vadd.f32 %v469_v38, %v457_v57  ;;  %s391_s7 = scalar_lea.vmem %s1102_s3, %s677_s14 }
  0x35   : > { %v478_v4 = vadd.f32 %v470_v51, %v458_v59  ;;  %v479_v5 = vadd.f32 %v471_v61, %v459_v60  ;;  %v739_v6 = vunpack.c.l.bf16 %v750_v58  ;;  %v472_v7 = vmul.f32 %v707_v29, %v1024_v28 }
  0x36   : > { %v494_v8 = vadd.f32 %v486_v40, %v474_v63  ;;  %v495_v9 = vadd.f32 %v487_v41, %v475_v0  ;;  %v496_v10 = vadd.f32 %v488_v43, %v476_v1  ;;  %v497_v11 = vadd.f32 %v489_v44, %v477_v2 }
  0x37   : > { %v498_v12 = vadd.f32 %v490_v52, %v478_v4  ;;  %v499_v13 = vadd.f32 %v491_v62, %v479_v5  ;;  %v460_v14 = vmul.f32 %v739_v6, %v1035_v33  ;;  %v492_v15 = vmul.f32 %v723_v30, %v1038_v34 }
  0x38   : > { %v506_v16 = vadd.f32 %v689_v3, %v494_v8  ;;  %v507_v17 = vadd.f32 %v689_v3, %v495_v9  ;;  %v508_v20 = vadd.f32 %v689_v3, %v496_v10  ;;  %v509_v21 = vadd.f32 %v689_v3, %v497_v11 }
  0x39   : > { %v510_v22 = vadd.f32 %v689_v3, %v498_v12  ;;  %v511_v23 = vadd.f32 %v689_v3, %v499_v13  ;;  %v480_v24 = vadd.f32 %v472_v7, %v460_v14  ;;  %v740_v25 = vunpack.c.h.bf16 %v750_v58 }
  0x3a   : > { %514 = vst [vmem:[%s391_s7] sm:$0xff] %v506_v16  ;;  %515 = vst [vmem:[%s391_s7 + $0x8] sm:$0xff] %v507_v17  ;;  %v473_v26 = vmul.f32 %v708_v31, %v1024_v28  ;;  %v493_v30 = vmul.f32 %v724_v32, %v1038_v34 }
  0x3b   : > { %516 = vst [vmem:[%s391_s7 + $0x10] sm:$0xff] %v508_v20  ;;  %517 = vst [vmem:[%s391_s7 + $0x18] sm:$0xff] %v509_v21  ;;  %v500_v27 = vadd.f32 %v492_v15, %v480_v24  ;;  %v461_v29 = vmul.f32 %v740_v25, %v1035_v33 }
  0x3c   : > { %518 = vst [vmem:[%s391_s7 + $0x20] sm:$0xff] %v510_v22  ;;  %519 = vst [vmem:[%s391_s7 + $0x28] sm:$0xff] %v511_v23 }
  0x3d   : > { %v512_v35 = vadd.f32 %v689_v3, %v500_v27  ;;  %v481_v36 = vadd.f32 %v473_v26, %v461_v29 }
  0x3f   : > { %520 = vst [vmem:[%s391_s7 + $0x30] sm:$0xff] %v512_v35  ;;  %v501_v37 = vadd.f32 %v493_v30, %v481_v36 }
  0x41   : > { %v513_v38 = vadd.f32 %v689_v3, %v501_v37 }
  0x43   : > { %521 = vst [vmem:[%s391_s7 + $0x38] sm:$0xff] %v513_v38 }
  0x44 PF: > { %s13_s20 = sadd.s32 1, %s893_s20   ;;  %s1105_s12 = smov %s865_s13 }
  0x45   : > { %p10_p0 = scmp.ge.s32.totalorder %s13_s20, 10   ;;  %s1106_s13 = smov %s994_s9 }
  0x46   : > { %s1107_s14 = smov %s881_s17  ;;  %s1108_s15 = smov %s885_s18 }
  0x47   : > { %s1109_s16 = smov %s889_s19  ;;  %s1110_s17 = smov %s1122_s21 }
  0x48   : > { %s1111_s18 = smov %s1118_s23  ;;  %s1112_s19 = smov %s1120_s24 }
  0x49   :  { %12 = sbr.rel (!%p10_p0) target bundleno = 5 (0x5), region = 115 }

</bundles_post_ra>
